<compile_context>
chip_gen: v7x
topology: tpu7x:2x2x1
jax: 0.10.0
libtpu: 0.0.40
codegen_flags: <defaults>
</compile_context>

<pallas_src>
import functools

import jax
import jax.numpy as jnp
from jax import lax
from jax.experimental import pallas as pl
from jax.experimental.pallas import tpu as pltpu


def _round_up(x, m):
    return ((x + m - 1) // m) * m


# ----------------------------- Pallas GRU kernel -----------------------------

def gru_kernel(x_ref, wih_ref, whh_ref, bgi_ref, bhn_ref, out_ref, gi_ref,
               *, seq_len, batch_pad):
    """Fused GRU over the full sequence (single grid step).

    x_ref   : (T*Bp, E)     embedded inputs, time-major rows (Bp rows per step)
    wih_ref : (E, 3*Hp)     input->hidden weights, gate order [r | z | n], lane-padded
    whh_ref : (Hp, 3*Hp)    hidden->hidden weights, gate order [r | z | n], lane-padded
    bgi_ref : (1, 3*Hp)     folded bias for gi: [b_ir+b_hr | b_iz+b_hz | b_in]
    bhn_ref : (1, Hp)       b_hn (only bias needed inside the recurrence)
    out_ref : (T*Bp, Hp)    outputs, same row layout as x_ref
    gi_ref  : (T*Bp, 3*Hp)  VMEM scratch for the precomputed input projection
    """
    hp = whh_ref.shape[0]

    # (1) Input projection for ALL time steps as one large MXU matmul.
    gi_ref[...] = (
        jnp.dot(x_ref[...], wih_ref[...], preferred_element_type=jnp.float32)
        + bgi_ref[...]
    )

    # Hoist loop-invariant loads out of the recurrence.
    whh = whh_ref[...]      # (Hp, 3Hp)
    bhn = bhn_ref[...]      # (1, Hp)

    # (2) Serial recurrence: one small matmul + gate math per step, h lives in vregs.
    def step(t, h):
        row = pl.multiple_of(t * batch_pad, 8)                 # sublane-aligned
        gi = gi_ref[pl.ds(row, batch_pad), :]                  # (Bp, 3Hp)
        gh = jnp.dot(h, whh, preferred_element_type=jnp.float32)
        # PyTorch GRU gate order: r, z, n (128-lane-aligned slices).
        r = jax.nn.sigmoid(gi[:, :hp] + gh[:, :hp])
        z = jax.nn.sigmoid(gi[:, hp:2 * hp] + gh[:, hp:2 * hp])
        n = jnp.tanh(gi[:, 2 * hp:] + r * (gh[:, 2 * hp:] + bhn))
        h_new = (1.0 - z) * n + z * h
        out_ref[pl.ds(row, batch_pad), :] = h_new.astype(out_ref.dtype)
        return h_new

    lax.fori_loop(0, seq_len, step, jnp.zeros((batch_pad, hp), jnp.float32))


def gru_pallas(x2d, wih_t, whh_t, bias_gi, bias_hn, *, seq_len, batch_pad):
    """x2d: (T*Bp, E) f32 -> outputs (T*Bp, Hp) f32."""
    tb, e = x2d.shape
    hp = whh_t.shape[0]
    h3 = 3 * hp

    kernel = functools.partial(gru_kernel, seq_len=seq_len, batch_pad=batch_pad)

    grid_spec = pltpu.PrefetchScalarGridSpec(
        num_scalar_prefetch=0,
        grid=(1,),  # whole sequence fused; recurrence runs inside the kernel
        in_specs=[
            pl.BlockSpec((tb, e), lambda i: (0, 0)),      # embedded (all steps)
            pl.BlockSpec((e, h3), lambda i: (0, 0)),      # W_ih^T (padded)
            pl.BlockSpec((hp, h3), lambda i: (0, 0)),     # W_hh^T (padded)
            pl.BlockSpec((1, h3), lambda i: (0, 0)),      # folded gi bias
            pl.BlockSpec((1, hp), lambda i: (0, 0)),      # b_hn
        ],
        out_specs=pl.BlockSpec((tb, hp), lambda i: (0, 0)),
        scratch_shapes=[pltpu.VMEM((tb, h3), jnp.float32)],
    )

    return pl.pallas_call(
        kernel,
        out_shape=jax.ShapeDtypeStruct((tb, hp), jnp.float32),
        grid_spec=grid_spec,
        compiler_params=pltpu.CompilerParams(
            dimension_semantics=("arbitrary",),
            vmem_limit_bytes=32 * 1024 * 1024,
        ),
    )(x2d, wih_t, whh_t, bias_gi, bias_hn)


# ------------------------------- Parameter prep -------------------------------

def make_encoder_params(key, vocab_len, embedding_dim, hidden_dim):
    """Raw PyTorch-like parameters (Embedding ~ N(0,1); GRU ~ U(-1/sqrt(H), 1/sqrt(H)))."""
    k_emb, k_wih, k_whh, k_bih, k_bhh = jax.random.split(key, 5)
    bound = 1.0 / jnp.sqrt(hidden_dim)
    return dict(
        embedding=jax.random.normal(k_emb, (vocab_len, embedding_dim), jnp.float32),
        w_ih=jax.random.uniform(k_wih, (3 * hidden_dim, embedding_dim),
                                jnp.float32, -bound, bound),
        w_hh=jax.random.uniform(k_whh, (3 * hidden_dim, hidden_dim),
                                jnp.float32, -bound, bound),
        b_ih=jax.random.uniform(k_bih, (3 * hidden_dim,), jnp.float32, -bound, bound),
        b_hh=jax.random.uniform(k_bhh, (3 * hidden_dim,), jnp.float32, -bound, bound),
    )


def prepare_encoder_params(raw):
    """One-time layout prep: transpose, pad each gate block to 128 lanes, fold biases."""
    w_ih, w_hh = raw["w_ih"], raw["w_hh"]       # (3H, E), (3H, H)
    b_ih, b_hh = raw["b_ih"], raw["b_hh"]       # (3H,), (3H,)
    h = w_hh.shape[1]
    e = w_ih.shape[1]
    hp = _round_up(h, 128)

    wih_t = jnp.zeros((e, 3 * hp), jnp.float32)
    whh_t = jnp.zeros((hp, 3 * hp), jnp.float32)
    bias_gi = jnp.zeros((1, 3 * hp), jnp.float32)
    bias_hn = jnp.zeros((1, hp), jnp.float32)
    for g in range(3):                           # gate order: r, z, n
        src = slice(g * h, (g + 1) * h)
        dst = slice(g * hp, g * hp + h)
        wih_t = wih_t.at[:, dst].set(w_ih[src].T)
        whh_t = whh_t.at[:h, dst].set(w_hh[src].T)
        fold = b_ih[src] + (b_hh[src] if g < 2 else 0.0)   # b_hn stays in the loop
        bias_gi = bias_gi.at[0, dst].set(fold)
    bias_hn = bias_hn.at[0, :h].set(b_hh[2 * h:])

    return dict(embedding=raw["embedding"], wih_t=wih_t, whh_t=whh_t,
                bias_gi=bias_gi, bias_hn=bias_hn)


# ------------------------------- Encoder wrapper -------------------------------

@functools.partial(jax.jit, static_argnames=("hidden_dim",))
def encoder_forward(params, input_batch, *, hidden_dim):
    """input_batch: (T, B) int32 -> (outputs (T, B, H), hidden (1, B, H))."""
    embedded = jnp.take(params["embedding"], input_batch, axis=0)   # (T, B, E)
    # nn.Dropout is identity in eval mode (GRU dropout is a no-op for n_layers=1).
    t, b, e = embedded.shape
    bp = _round_up(b, 8)                      # full sublanes per time step
    if bp != b:
        embedded = jnp.pad(embedded, ((0, 0), (0, bp - b), (0, 0)))
    x2d = embedded.reshape(t * bp, e)

    out2d = gru_pallas(x2d, params["wih_t"], params["whh_t"],
                       params["bias_gi"], params["bias_hn"],
                       seq_len=t, batch_pad=bp)

    outputs = out2d.reshape(t, bp, -1)[:, :b, :hidden_dim]          # (T, B, H)
    hidden = outputs[-1:]                                           # (1, B, H)
    return outputs, hidden


# ------------------------------ Pure-JAX reference ----------------------------

def encoder_reference(raw, input_batch):
    embedded = raw["embedding"][input_batch]
    _, b, _ = embedded.shape
    h_dim = raw["w_hh"].shape[1]
    w_ih_t, w_hh_t = raw["w_ih"].T, raw["w_hh"].T
    b_ih, b_hh = raw["b_ih"], raw["b_hh"]

    def step(h, x):
        gi = x @ w_ih_t + b_ih
        gh = h @ w_hh_t + b_hh
        r = jax.nn.sigmoid(gi[:, :h_dim] + gh[:, :h_dim])
        z = jax.nn.sigmoid(gi[:, h_dim:2 * h_dim] + gh[:, h_dim:2 * h_dim])
        n = jnp.tanh(gi[:, 2 * h_dim:] + r * gh[:, 2 * h_dim:])
        h_new = (1.0 - z) * n + z * h
        return h_new, h_new

    h0 = jnp.zeros((b, h_dim), jnp.float32)
    h_last, outs = lax.scan(step, h0, embedded)
    return outs, h_last[None]


# ------------------------------------ main ------------------------------------

if __name__ == "__main__":
    vocab_len = 50
    embedding_dim = 32
    hidden_dim = 32
    seq_len = 8
    batch = 2

    key = jax.random.PRNGKey(0)
    k_params, k_tokens = jax.random.split(key)
    raw = make_encoder_params(k_params, vocab_len, embedding_dim, hidden_dim)
    params = prepare_encoder_params(raw)
    input_batch = jax.random.randint(k_tokens, (seq_len, batch), 0, vocab_len,
                                     dtype=jnp.int32)

    outputs, hidden = encoder_forward(params, input_batch, hidden_dim=hidden_dim)
    jax.block_until_ready((outputs, hidden))

    ref_out, ref_hid = encoder_reference(raw, input_batch)
    assert outputs.shape == (seq_len, batch, hidden_dim)
    assert hidden.shape == (1, batch, hidden_dim)
    assert jnp.allclose(outputs, ref_out, atol=1e-5, rtol=1e-5)
    assert jnp.allclose(hidden, ref_hid, atol=1e-5, rtol=1e-5)

    print("KERNEL_OK")
</pallas_src>

<mosaic_0001>
module attributes {stable_mosaic.version = 11 : i64} {
  func.func @gru_kernel(%arg0: i32, %arg1: memref<64x32xf32, #tpu.memory_space<vmem>>, %arg2: memref<32x384xf32, #tpu.memory_space<vmem>>, %arg3: memref<128x384xf32, #tpu.memory_space<vmem>>, %arg4: memref<1x384xf32, #tpu.memory_space<vmem>>, %arg5: memref<1x128xf32, #tpu.memory_space<vmem>>, %arg6: memref<64x128xf32, #tpu.memory_space<vmem>>, %arg7: memref<64x384xf32, #tpu.memory_space<vmem>>) attributes {dimension_semantics = [#tpu.dimension_semantics<arbitrary>], iteration_bounds = array<i64: 1>, scalar_prefetch = 0 : i64, scratch_operands = 1 : i64, tpu.core_type = #tpu.core_type<tc>, window_params = [{pipeline_mode = #tpu.pipeline_mode<synchronous>, transform_indices = @transform_0, window_bounds = array<i64: 64, 32>}, {pipeline_mode = #tpu.pipeline_mode<synchronous>, transform_indices = @transform_1, window_bounds = array<i64: 32, 384>}, {pipeline_mode = #tpu.pipeline_mode<synchronous>, transform_indices = @transform_2, window_bounds = array<i64: 128, 384>}, {pipeline_mode = #tpu.pipeline_mode<synchronous>, transform_indices = @transform_3, window_bounds = array<i64: 1, 384>}, {pipeline_mode = #tpu.pipeline_mode<synchronous>, transform_indices = @transform_4, window_bounds = array<i64: 1, 128>}, {pipeline_mode = #tpu.pipeline_mode<synchronous>, transform_indices = @transform_5, window_bounds = array<i64: 64, 128>}]} {
    %c0 = arith.constant 0 : index
    %c0_0 = arith.constant 0 : index
    %0 = vector.load %arg1[%c0, %c0_0] : memref<64x32xf32, #tpu.memory_space<vmem>>, vector<64x32xf32>
    %c0_1 = arith.constant 0 : index
    %c0_2 = arith.constant 0 : index
    %1 = vector.load %arg2[%c0_1, %c0_2] : memref<32x384xf32, #tpu.memory_space<vmem>>, vector<32x384xf32>
    %cst = arith.constant dense<0.000000e+00> : vector<64x384xf32>
    %2 = tpu.matmul %0, %1, %cst {dimension_numbers = #tpu.dot_dimension_numbers<[1], [0], [0], [1], [0, 0, 1, 1], [], []>} : vector<64x32xf32>, vector<32x384xf32>, vector<64x384xf32> -> vector<64x384xf32>
    %c0_3 = arith.constant 0 : index
    %c0_4 = arith.constant 0 : index
    %3 = vector.load %arg4[%c0_3, %c0_4] : memref<1x384xf32, #tpu.memory_space<vmem>>, vector<1x384xf32>
    %4 = vector.broadcast %3 : vector<1x384xf32> to vector<64x384xf32>
    %5 = arith.addf %2, %4 : vector<64x384xf32>
    %c0_5 = arith.constant 0 : index
    %c0_6 = arith.constant 0 : index
    %6 = vector.load %arg7[%c0_5, %c0_6] : memref<64x384xf32, #tpu.memory_space<vmem>>, vector<64x384xf32>
    tpu.vector_store %arg7[%c0_5, %c0_6], %5 {strides = array<i32>} : memref<64x384xf32, #tpu.memory_space<vmem>>, vector<64x384xf32>,
    %c0_7 = arith.constant 0 : index
    %c0_8 = arith.constant 0 : index
    %7 = vector.load %arg3[%c0_7, %c0_8] : memref<128x384xf32, #tpu.memory_space<vmem>>, vector<128x384xf32>
    %c0_9 = arith.constant 0 : index
    %c0_10 = arith.constant 0 : index
    %8 = vector.load %arg5[%c0_9, %c0_10] : memref<1x128xf32, #tpu.memory_space<vmem>>, vector<1x128xf32>
    %cst_11 = arith.constant 0.000000e+00 : f32
    %9 = vector.broadcast %cst_11 : f32 to vector<8x128xf32>
    %c0_i32 = arith.constant 0 : i32
    %c8_i32 = arith.constant 8 : i32
    %10 = arith.addi %c0_i32, %c8_i32 : i32
    %c1_i32 = arith.constant 1 : i32
    %11 = scf.for %arg8 = %c0_i32 to %10 step %c1_i32 iter_args(%arg9 = %9) -> (vector<8x128xf32>)  : i32 {
      %c8_i32_13 = arith.constant 8 : i32
      %12 = arith.muli %arg8, %c8_i32_13 : i32
      %13 = tpu.assume_multiple %12, 8 : i32
      %14 = arith.index_cast %13 : i32 to index
      %c0_14 = arith.constant 0 : index
      %15 = vector.load %arg7[%14, %c0_14] : memref<64x384xf32, #tpu.memory_space<vmem>>, vector<8x384xf32>
      %cst_15 = arith.constant dense<0.000000e+00> : vector<8x384xf32>
      %16 = tpu.matmul %arg9, %7, %cst_15 {dimension_numbers = #tpu.dot_dimension_numbers<[1], [0], [0], [1], [0, 0, 1, 1], [], []>} : vector<8x128xf32>, vector<128x384xf32>, vector<8x384xf32> -> vector<8x384xf32>
      %17 = vector.extract_strided_slice %15 {offsets = [0, 0], sizes = [8, 128], strides = [1, 1]} : vector<8x384xf32> to vector<8x128xf32>
      %18 = vector.extract_strided_slice %16 {offsets = [0, 0], sizes = [8, 128], strides = [1, 1]} : vector<8x384xf32> to vector<8x128xf32>
      %19 = arith.addf %17, %18 : vector<8x128xf32>
      %20 = arith.negf %19 : vector<8x128xf32>
      %21 = math.exp %20 : vector<8x128xf32>
      %cst_16 = arith.constant 1.000000e+00 : f32
      %22 = vector.broadcast %cst_16 : f32 to vector<8x128xf32>
      %23 = arith.addf %22, %21 : vector<8x128xf32>
      %24 = arith.divf %22, %23 : vector<8x128xf32>
      %25 = vector.extract_strided_slice %15 {offsets = [0, 128], sizes = [8, 128], strides = [1, 1]} : vector<8x384xf32> to vector<8x128xf32>
      %26 = vector.extract_strided_slice %16 {offsets = [0, 128], sizes = [8, 128], strides = [1, 1]} : vector<8x384xf32> to vector<8x128xf32>
      %27 = arith.addf %25, %26 : vector<8x128xf32>
      %28 = arith.negf %27 : vector<8x128xf32>
      %29 = math.exp %28 : vector<8x128xf32>
      %cst_17 = arith.constant 1.000000e+00 : f32
      %30 = vector.broadcast %cst_17 : f32 to vector<8x128xf32>
      %31 = arith.addf %30, %29 : vector<8x128xf32>
      %32 = arith.divf %30, %31 : vector<8x128xf32>
      %33 = vector.extract_strided_slice %15 {offsets = [0, 256], sizes = [8, 128], strides = [1, 1]} : vector<8x384xf32> to vector<8x128xf32>
      %34 = vector.extract_strided_slice %16 {offsets = [0, 256], sizes = [8, 128], strides = [1, 1]} : vector<8x384xf32> to vector<8x128xf32>
      %35 = vector.broadcast %8 : vector<1x128xf32> to vector<8x128xf32>
      %36 = arith.addf %34, %35 : vector<8x128xf32>
      %37 = arith.mulf %24, %36 : vector<8x128xf32>
      %38 = arith.addf %33, %37 : vector<8x128xf32>
      %39 = math.tanh %38 : vector<8x128xf32>
      %cst_18 = arith.constant 1.000000e+00 : f32
      %40 = vector.broadcast %cst_18 : f32 to vector<8x128xf32>
      %41 = arith.subf %40, %32 : vector<8x128xf32>
      %42 = arith.mulf %41, %39 : vector<8x128xf32>
      %43 = arith.mulf %32, %arg9 : vector<8x128xf32>
      %44 = arith.addf %42, %43 : vector<8x128xf32>
      %45 = arith.index_cast %13 : i32 to index
      %c0_19 = arith.constant 0 : index
      %46 = vector.load %arg6[%45, %c0_19] : memref<64x128xf32, #tpu.memory_space<vmem>>, vector<8x128xf32>
      tpu.vector_store %arg6[%45, %c0_19], %44 {strides = array<i32>} : memref<64x128xf32, #tpu.memory_space<vmem>>, vector<8x128xf32>,
      scf.yield %44 : vector<8x128xf32>
    }
    %c8_i32_12 = arith.constant 8 : i32
    return
  }
  func.func @transform_0(%arg0: i32) -> (i32, i32) {
    %c0_i32 = arith.constant 0 : i32
    %c0_i32_0 = arith.constant 0 : i32
    %c0_i32_1 = arith.constant 0 : i32
    return %c0_i32, %c0_i32_0 : i32, i32
  }
  func.func @transform_1(%arg0: i32) -> (i32, i32) {
    %c0_i32 = arith.constant 0 : i32
    %c0_i32_0 = arith.constant 0 : i32
    %c0_i32_1 = arith.constant 0 : i32
    return %c0_i32, %c0_i32_0 : i32, i32
  }
  func.func @transform_2(%arg0: i32) -> (i32, i32) {
    %c0_i32 = arith.constant 0 : i32
    %c0_i32_0 = arith.constant 0 : i32
    %c0_i32_1 = arith.constant 0 : i32
    return %c0_i32, %c0_i32_0 : i32, i32
  }
  func.func @transform_3(%arg0: i32) -> (i32, i32) {
    %c0_i32 = arith.constant 0 : i32
    %c0_i32_0 = arith.constant 0 : i32
    %c0_i32_1 = arith.constant 0 : i32
    return %c0_i32, %c0_i32_0 : i32, i32
  }
  func.func @transform_4(%arg0: i32) -> (i32, i32) {
    %c0_i32 = arith.constant 0 : i32
    %c0_i32_0 = arith.constant 0 : i32
    %c0_i32_1 = arith.constant 0 : i32
    return %c0_i32, %c0_i32_0 : i32, i32
  }
  func.func @transform_5(%arg0: i32) -> (i32, i32) {
    %c0_i32 = arith.constant 0 : i32
    %c0_i32_0 = arith.constant 0 : i32
    %c0_i32_1 = arith.constant 0 : i32
    return %c0_i32, %c0_i32_0 : i32, i32
  }
}

</mosaic_0001>

<bundles_post_ra>
// kernel: encoder_forward.1
= control target key start
LH: loop header
LB: loop body
LE: loop exit
PB: predicated region body
PF: predicated region fallthrough
CT: control target
= control target key end

     0   :  { %10 = vsyncpa [#allocation4], 0  ;;  %s846_s18 = smov [#allocation3]   ;;  %s1286_s0 = inlined_call_operand.vmem [shape: f32[64,32], index: 0, kind: input, shape index: {}]   ;;  %s1287_s1 = inlined_call_operand.hbm [shape: f32[32,384], index: 1, kind: input, shape index: {}]   ;;  %s1288_s2 = inlined_call_operand.vmem [shape: f32[128,384], index: 2, kind: input, shape index: {}]   ;;  %s1289_s3 = inlined_call_operand.vmem [shape: f32[1,384], index: 3, kind: input, shape index: {}]   ;;  %s1290_s4 = inlined_call_operand.vmem [shape: f32[1,128], index: 4, kind: input, shape index: {}]   ;;  %s1291_s5 = inlined_call_operand.vmem [shape: f32[64,128], index: 5, kind: output, shape index: {}]  }
   0x1   :  { %s18_s19 = sshll.u32 %s846_s18, 4  ;;  %s806_s22 = scalar_lea.hbm %s1287_s1, 1536  ;;  %s19_s19 = int_to_ptr.vmem [resolvable:$true] %s18_s19 }
   0x2   :  { %p807_p0 = scmp.ne.s32.totalorder %s1287_s1, %s806_s22  ;;  %p810_p1 = scmp.lt.u32.totalorder %s806_s22, %s1287_s1 }
   0x4   :  { %p812_p2 = pnand %p810_p1, %p807_p0 }
   0x6   :  { %815 = shalt.err (!%p812_p2)
}
   0x7   :  { %s816_s27 = scalar_lea.vmem %s19_s19, 1536  ;;  %p821_p4 = scmp.lt.s32.totalorder %s19_s19, %s19_s19 }
   0x8   :  { %p817_p3 = scmp.ne.s32.totalorder %s19_s19, %s816_s27  ;;  %p822_p5 = scmp.lt.s32.totalorder %s816_s27, %s816_s27 }
   0xa   :  { %p823_p6 = por %p822_p5, %p821_p4 }
   0xc   :  { %p824_p7 = pnand %p823_p6, %p817_p3 }
   0xe   :  { %827 = shalt.err (!%p824_p7)
}
   0xf   :  { %s847_s28 = smov 384   ;;  %s848_s29 = smov 24  }
  0x10   :  { %24 = dma.hbm_to_vmem [thread:$0]  %s1287_s1, 1536, %s19_s19, [#allocation4], %s847_s28, %s847_s28, %s848_s29  }
  0x11   :  { %836 = dma.done.wait [#allocation4], 1536  }
  0x12   :  { %837 = vsyncadd [#allocation4], 4294965760  ;;  %v1292_v0 = vmov 0.0   ;;  %v900_v1 = vld [vmem:[%s1288_s2] sm:$0xff]  ;;  %v905_v2 = vld [vmem:[%s1288_s2 + $0x8] sm:$0xff]  ;;  %vm71_vm0 = vcmask 261120  }
  0x13   :  { %160 = vmatprep.mubr.f32.mxu0 %v1292_v0  ;;  %196 = vmatprep.mubr.f32.mxu1 %v1292_v0  ;;  %v910_v3 = vld [vmem:[%s1288_s2 + $0x10] sm:$0xff]  ;;  %v915_v4 = vld [vmem:[%s1288_s2 + $0x18] sm:$0xff]  ;;  %v920_v5 = vld [vmem:[%s1288_s2 + $0x20] sm:$0xff] }
  0x14   :  { %v925_v6 = vld [vmem:[%s1288_s2 + $0x28] sm:$0xff]  ;;  %v930_v7 = vld [vmem:[%s1288_s2 + $0x30] sm:$0xff]  ;;  %v935_v8 = vld [vmem:[%s1288_s2 + $0x38] sm:$0xff] }
  0x15   :  { %v940_v9 = vld [vmem:[%s1288_s2 + $0x40] sm:$0xff]  ;;  %v945_v10 = vld [vmem:[%s1288_s2 + $0x48] sm:$0xff]  ;;  %v950_v11 = vld [vmem:[%s1288_s2 + $0x50] sm:$0xff] }
  0x16   :  { %v955_v12 = vld [vmem:[%s1288_s2 + $0x58] sm:$0xff]  ;;  %v960_v13 = vld [vmem:[%s1288_s2 + $0x60] sm:$0xff]  ;;  %v965_v14 = vld [vmem:[%s1288_s2 + $0x68] sm:$0xff] }
  0x17   :  { %v970_v15 = vld [vmem:[%s1288_s2 + $0x70] sm:$0xff]  ;;  %v975_v16 = vld [vmem:[%s1288_s2 + $0x78] sm:$0xff]  ;;  %v980_v17 = vld [vmem:[%s1288_s2 + $0x80] sm:$0xff] }
  0x18   :  { %v985_v18 = vld [vmem:[%s1288_s2 + $0x88] sm:$0xff]  ;;  %v990_v19 = vld [vmem:[%s1288_s2 + $0x90] sm:$0xff]  ;;  %v995_v20 = vld [vmem:[%s1288_s2 + $0x98] sm:$0xff] }
  0x19   :  { %v1000_v21 = vld [vmem:[%s1288_s2 + $0xa0] sm:$0xff]  ;;  %v1005_v22 = vld [vmem:[%s1288_s2 + $0xa8] sm:$0xff]  ;;  %v1010_v23 = vld [vmem:[%s1288_s2 + $0xb0] sm:$0xff] }
  0x1a   :  { %v1015_v24 = vld [vmem:[%s1288_s2 + $0xb8] sm:$0xff]  ;;  %v1020_v25 = vld [vmem:[%s1288_s2 + $0xc0] sm:$0xff]  ;;  %v1025_v26 = vld [vmem:[%s1288_s2 + $0xc8] sm:$0xff] }
  0x1b   :  { %v1030_v27 = vld [vmem:[%s1288_s2 + $0xd0] sm:$0xff]  ;;  %v1035_v28 = vld [vmem:[%s1288_s2 + $0xd8] sm:$0xff]  ;;  %v1040_v29 = vld [vmem:[%s1288_s2 + $0xe0] sm:$0xff] }
  0x1c   :  { %v1045_v30 = vld [vmem:[%s1288_s2 + $0xe8] sm:$0xff]  ;;  %v1050_v31 = vld [vmem:[%s1288_s2 + $0xf0] sm:$0xff]  ;;  %v1055_v32 = vld [vmem:[%s1288_s2 + $0xf8] sm:$0xff] }
  0x1d   :  { %v1060_v33 = vld [vmem:[%s1288_s2 + $0x100] sm:$0xff]  ;;  %v1065_v34 = vld [vmem:[%s1288_s2 + $0x108] sm:$0xff]  ;;  %v1070_v35 = vld [vmem:[%s1288_s2 + $0x110] sm:$0xff] }
  0x1e   :  { %v1075_v36 = vld [vmem:[%s1288_s2 + $0x118] sm:$0xff]  ;;  %v1080_v37 = vld [vmem:[%s1288_s2 + $0x120] sm:$0xff]  ;;  %v1085_v38 = vld [vmem:[%s1288_s2 + $0x128] sm:$0xff] }
  0x1f   :  { %v1090_v39 = vld [vmem:[%s1288_s2 + $0x130] sm:$0xff]  ;;  %v1095_v40 = vld [vmem:[%s1288_s2 + $0x138] sm:$0xff]  ;;  %v1100_v41 = vld [vmem:[%s1288_s2 + $0x140] sm:$0xff] }
  0x20   :  { %v1105_v42 = vld [vmem:[%s1288_s2 + $0x148] sm:$0xff]  ;;  %v1110_v43 = vld [vmem:[%s1288_s2 + $0x150] sm:$0xff]  ;;  %v1115_v44 = vld [vmem:[%s1288_s2 + $0x158] sm:$0xff] }
  0x21   :  { %v1120_v45 = vld [vmem:[%s1288_s2 + $0x160] sm:$0xff]  ;;  %v1125_v46 = vld [vmem:[%s1288_s2 + $0x168] sm:$0xff]  ;;  %v1130_v47 = vld [vmem:[%s1288_s2 + $0x170] sm:$0xff] }
  0x22   :  { %1294 = vst [vmem:[#allocation6_spill] sm:$0xff] %v1120_v45  ;;  %1295 = vst [vmem:[#allocation7_spill] sm:$0xff] %v1125_v46  ;;  %v1135_v48 = vld [vmem:[%s1288_s2 + $0x178] sm:$0xff]  ;;  %v1140_v49 = vld [vmem:[%s1290_s4] ss:$0 sm:$0xff] }
  0x23   :  { %1296 = vst [vmem:[#allocation8_spill] sm:$0xff] %v1135_v48  ;;  %1297 = vst [vmem:[#allocation9_spill] sm:$0xff] %v1140_v49  ;;  %v43_v50 = vld [vmem:[#allocation3 + $0x8] sm:$0xff]  ;;  %v46_v51 = vld [vmem:[#allocation3 + $0x20] sm:$0xff] }
  0x24   :  { %v697_v52 = vpack.c.bf16 %v46_v51, %v43_v50  ;;  %v42_v53 = vld [vmem:[#allocation3] sm:$0xff]  ;;  %v45_v54 = vld [vmem:[#allocation3 + $0x18] sm:$0xff]  ;;  %v52_v57 = vld [vmem:[#allocation3 + $0x50] sm:$0xff] }
  0x25   :  { %v49_v55 = vld [vmem:[#allocation3 + $0x38] sm:$0xff]  ;;  %v699_v56 = vpack.c.bf16 %v45_v54, %v42_v53  ;;  %v48_v58 = vld [vmem:[#allocation3 + $0x30] sm:$0xff]  ;;  %v51_v59 = vld [vmem:[#allocation3 + $0x48] sm:$0xff]  ;;  %v1298_v54 = vmov 0.0  }
  0x26   :  { %698 = vmatprep.subr.bf16.mxu0 %v697_v52  ;;  %769 = vmatprep.subr.bf16.mxu1 %v697_v52  ;;  %v701_v60 = vpack.c.bf16 %v52_v57, %v49_v55  ;;  %v44_v61 = vld [vmem:[#allocation3 + $0x10] sm:$0xff]  ;;  %v703_v62 = vpack.c.bf16 %v51_v59, %v48_v58  ;;  %v47_v63 = vld [vmem:[#allocation3 + $0x28] sm:$0xff]  ;;  %v50_v49 = vld [vmem:[#allocation3 + $0x40] sm:$0xff]  ;;  %v56_v59 = vlaneseq }
  0x27   :  { %700 = vmatpush1.bf16.msra.mxu0 %v699_v56  ;;  %771 = vmatpush1.bf16.msra.mxu1 %v699_v56  ;;  %v705_v0 = vpack.c.bf16 %v47_v63, %v44_v61  ;;  %v53_v50 = vld [vmem:[#allocation3 + $0x58] sm:$0xff]  ;;  %v34_v51 = vld [vmem:[%s1286_s0] sm:$0xff]  ;;  %v40_v52 = vld [vmem:[%s1286_s0 + $0x30] sm:$0xff] }
  0x28   :  { %702 = vmatprep.subr.bf16.mxu0 %v701_v60  ;;  %770 = vmatprep.subr.bf16.mxu1 %v701_v60  ;;  %v709_v53 = vpack.c.bf16 %v53_v50, %v50_v49  ;;  %v35_v55 = vld [vmem:[%s1286_s0 + $0x8] sm:$0xff]  ;;  %v41_v56 = vld [vmem:[%s1286_s0 + $0x38] sm:$0xff]  ;;  %v38_v57 = vld [vmem:[%s1286_s0 + $0x20] sm:$0xff]  ;;  %v57_v60 = vshrl.u32 %v56_v59, 7 }
  0x29   :  { %v37_v49 = vld [vmem:[%s1286_s0 + $0x18] sm:$0xff]  ;;  %v39_v58 = vld [vmem:[%s1286_s0 + $0x28] sm:$0xff] }
  0x2a   :  { %v58_v61 = vsub.s32 0, %v57_v60  ;;  %v62_v63 = vsub.s32 1, %v57_v60 }
  0x2b   :  { %704 = vmatpush1.bf16.msra.mxu0 %v703_v62  ;;  %772 = vmatpush1.bf16.msra.mxu1 %v703_v62  ;;  %v54_v62 = vld [vmem:[%s1289_s3] sm:$0x7] }
  0x2c   :  { %706 = vmatprep.subr.bf16.mxu1 %v705_v0  ;;  %v1191_v50 = vrot.slane %v54_v62, %v58_v61 }
  0x2e   :  { %591 = vmatmul.mubr.msk.f32.vlgmr.msra.gmra.mrb[0].mxu0 %vm71_vm0, %v34_v51  ;;  %597 = vmatmul.mubr.msk.f32.vlgmr.msra.gmra.mrb[0].mxu1 %vm71_vm0, %v40_v52 }
  0x2f   :  { %708 = vmatpush3.bf16.msra.mxu1 %v705_v0  ;;  %166 = vmatprep.mubr.f32.mxu0 %v1298_v54  ;;  %v36_v0 = vld [vmem:[%s1286_s0 + $0x10] sm:$0xff]  ;;  %s1213_s0 = smov 0  }
  0x30   :  { %202 = vmatprep.mubr.f32.mxu1 %v1298_v54  ;;  %710 = vmatprep.subr.bf16.mxu1 %v709_v53 }
  0x32   :  { %592 = vmatmul.mubr.msk.f32.gmra.mrb[2].mxu0 %vm71_vm0, %v35_v55  ;;  %598 = vmatmul.mubr.msk.f32.gmra.mrb[2].mxu1 %vm71_vm0, %v41_v56 }
  0x33   :  { %712 = vmatpush3.bf16.msra.mxu1 %v709_v53  ;;  %172 = vmatprep.mubr.f32.mxu0 %v1298_v54 }
  0x34   :  { %650 = vmatprep.mubr.msk.f32.mxu1 %vm71_vm0, %v34_v51  ;;  %v1193_v51 = vrot.slane %v54_v62, %v62_v63 }
  0x36   :  { %593 = vmatmul.mubr.msk.f32.gmra.mrb[4].mxu0 %vm71_vm0, %v36_v0  ;;  %651 = vmatmul.mubr.msk.f32.vlgmr.msra.gmra.mrb[4].mxu1 %vm71_vm0, %v35_v55 }
  0x37   :  { %178 = vmatprep.mubr.f32.mxu0 %v1298_v54  ;;  %653 = vmatprep.mubr.msk.f32.mxu1 %vm71_vm0, %v36_v0 }
  0x3a   :  { %594 = vmatmul.mubr.msk.f32.gmra.mrb[6].mxu0 %vm71_vm0, %v37_v49  ;;  %654 = vmatmul.mubr.msk.f32.gmra.mrb[6].mxu1 %vm71_vm0, %v37_v49  ;;  %v66_v49 = vsub.s32 2, %v57_v60 }
  0x3b   :  { %184 = vmatprep.mubr.f32.mxu0 %v1298_v54  ;;  %656 = vmatprep.mubr.msk.f32.mxu1 %vm71_vm0, %v38_v57 }
  0x3e   :  { %595 = vmatmul.mubr.msk.f32.gmra.mrb[8].mxu0 %vm71_vm0, %v38_v57  ;;  %657 = vmatmul.mubr.msk.f32.gmra.mrb[8].mxu1 %vm71_vm0, %v39_v58 }
  0x3f   :  { %190 = vmatprep.mubr.f32.mxu0 %v1298_v54  ;;  %659 = vmatprep.mubr.msk.f32.mxu1 %vm71_vm0, %v40_v52 }
  0x42   :  { %596 = vmatmul.mubr.msk.f32.gmra.mrb[10].mxu0 %vm71_vm0, %v39_v58  ;;  %660 = vmatmul.mubr.msk.f32.gmra.mrb[10].mxu1 %vm71_vm0, %v41_v56 }
 0x101   :  { %v162_v53 = vpop.f32.mrb[0].mxu0  ;;  %v198_v54 = vpop.f32.mrb[0].mxu1 }
 0x102   :  { %v163_v52 = vadd.f32 %v162_v53, %v1191_v50  ;;  %v199_v55 = vadd.f32 %v198_v54, %v1191_v50  ;;  %v164_v0 = vpop.f32.mrb[1].mxu0  ;;  %v200_v56 = vpop.f32.mrb[1].mxu1  ;;  %v67_v54 = vrot.slane %v54_v62, %v66_v49 }
 0x103   :  { %v165_v57 = vadd.f32 %v164_v0, %v1193_v51  ;;  %v201_v58 = vadd.f32 %v200_v56, %v1193_v51 }
 0x104   :  { %314 = vst [vmem:[#allocation2] sm:$0xff] %v163_v52  ;;  %332 = vst [vmem:[#allocation2 + $0x90] sm:$0xff] %v199_v55 }
 0x105   :  { %315 = vst [vmem:[#allocation2 + $0x8] sm:$0xff] %v165_v57  ;;  %333 = vst [vmem:[#allocation2 + $0x98] sm:$0xff] %v201_v58  ;;  %v168_v59 = vpop.f32.mrb[2].mxu0  ;;  %v204_v61 = vpop.f32.mrb[2].mxu1 }
 0x106   :  { %v169_v63 = vadd.f32 %v168_v59, %v1191_v50  ;;  %v205_v48 = vadd.f32 %v204_v61, %v1191_v50  ;;  %v170_v53 = vpop.f32.mrb[3].mxu0  ;;  %v206_v45 = vpop.f32.mrb[3].mxu1 }
 0x107   :  { %v171_v46 = vadd.f32 %v170_v53, %v1193_v51  ;;  %v207_v60 = vadd.f32 %v206_v45, %v1193_v51 }
 0x108   :  { %317 = vst [vmem:[#allocation2 + $0x18] sm:$0xff] %v169_v63  ;;  %335 = vst [vmem:[#allocation2 + $0xa8] sm:$0xff] %v205_v48 }
 0x109   :  { %318 = vst [vmem:[#allocation2 + $0x20] sm:$0xff] %v171_v46  ;;  %336 = vst [vmem:[#allocation2 + $0xb0] sm:$0xff] %v207_v60  ;;  %v174_v52 = vpop.f32.mrb[4].mxu0  ;;  %v652_v55 = vpop.f32.mrb[4].mxu1 }
 0x10a   :  { %v175_v0 = vadd.f32 %v174_v52, %v1191_v50  ;;  %v281_v56 = vadd.f32 %v652_v55, %v67_v54  ;;  %v176_v57 = vpop.f32.mrb[5].mxu0  ;;  %v275_v58 = vpop.f32.mrb[5].mxu1 }
 0x10b   :  { %v177_v59 = vadd.f32 %v176_v57, %v1193_v51  ;;  %v276_v61 = vadd.f32 %v275_v58, %v67_v54 }
 0x10c   :  { %320 = vst [vmem:[#allocation2 + $0x30] sm:$0xff] %v175_v0  ;;  %319 = vst [vmem:[#allocation2 + $0x28] sm:$0xff] %v281_v56 }
 0x10d   :  { %321 = vst [vmem:[#allocation2 + $0x38] sm:$0xff] %v177_v59  ;;  %316 = vst [vmem:[#allocation2 + $0x10] sm:$0xff] %v276_v61  ;;  %v180_v62 = vpop.f32.mrb[6].mxu0  ;;  %v655_v45 = vpop.f32.mrb[6].mxu1 }
 0x10e   :  { %v181_v48 = vadd.f32 %v180_v62, %v1191_v50  ;;  %v291_v46 = vadd.f32 %v655_v45, %v67_v54  ;;  %v182_v49 = vpop.f32.mrb[7].mxu0  ;;  %v285_v63 = vpop.f32.mrb[7].mxu1 }
 0x10f   :  { %v183_v53 = vadd.f32 %v182_v49, %v1193_v51  ;;  %v286_v60 = vadd.f32 %v285_v63, %v67_v54 }
 0x110   :  { %323 = vst [vmem:[#allocation2 + $0x48] sm:$0xff] %v181_v48  ;;  %325 = vst [vmem:[#allocation2 + $0x58] sm:$0xff] %v291_v46 }
 0x111   :  { %324 = vst [vmem:[#allocation2 + $0x50] sm:$0xff] %v183_v53  ;;  %322 = vst [vmem:[#allocation2 + $0x40] sm:$0xff] %v286_v60  ;;  %v186_v52 = vpop.f32.mrb[8].mxu0  ;;  %v658_v55 = vpop.f32.mrb[8].mxu1 }
 0x112   :  { %v187_v0 = vadd.f32 %v186_v52, %v1191_v50  ;;  %v301_v56 = vadd.f32 %v658_v55, %v67_v54  ;;  %v188_v57 = vpop.f32.mrb[9].mxu0  ;;  %v295_v58 = vpop.f32.mrb[9].mxu1  ;;  %v1211_v52 = vmov 0.0  }
 0x113   :  { %v189_v59 = vadd.f32 %v188_v57, %v1193_v51  ;;  %v296_v61 = vadd.f32 %v295_v58, %v67_v54 }
 0x114   :  { %326 = vst [vmem:[#allocation2 + $0x60] sm:$0xff] %v187_v0  ;;  %331 = vst [vmem:[#allocation2 + $0x88] sm:$0xff] %v301_v56 }
 0x115   :  { %327 = vst [vmem:[#allocation2 + $0x68] sm:$0xff] %v189_v59  ;;  %328 = vst [vmem:[#allocation2 + $0x70] sm:$0xff] %v296_v61  ;;  %v192_v62 = vpop.f32.mrb[10].mxu0  ;;  %v661_v45 = vpop.f32.mrb[10].mxu1 }
 0x116   :  { %v193_v48 = vadd.f32 %v192_v62, %v1191_v50  ;;  %v311_v46 = vadd.f32 %v661_v45, %v67_v54  ;;  %v194_v49 = vpop.f32.mrb[11].mxu0  ;;  %v305_v63 = vpop.f32.mrb[11].mxu1 }
 0x117   :  { %v195_v53 = vadd.f32 %v194_v49, %v1193_v51  ;;  %v306_v60 = vadd.f32 %v305_v63, %v67_v54 }
 0x118   :  { %329 = vst [vmem:[#allocation2 + $0x78] sm:$0xff] %v193_v48  ;;  %337 = vst [vmem:[#allocation2 + $0xb8] sm:$0xff] %v311_v46 }
 0x119   :  { %330 = vst [vmem:[#allocation2 + $0x80] sm:$0xff] %v195_v53  ;;  %334 = vst [vmem:[#allocation2 + $0xa0] sm:$0xff] %v306_v60 }
 0x11a LB: > { %v713_v50 = vpack.c.bf16 %v920_v5, %v905_v2  ;;  %v715_v51 = vpack.c.bf16 %v915_v4, %v900_v1  ;;  %v717_v54 = vpack.c.bf16 %v950_v11, %v935_v8  ;;  %v719_v55 = vpack.c.bf16 %v945_v10, %v930_v7  ;;  %s607_s3 = sshll.u32 %s844_s0, 3  ;;  %s392_s0 = sadd.s32 1, %s844_s0   ;;  %s844_s0 = sphi %s1213_s0, %s392_s0   ;;  %v840_v52 = vphi %v1211_v52, %v571_v52  }
 0x11b   : > { %v746_v0 = vpack.c.bf16 %v925_v6, %v910_v3  ;;  %v721_v56 = vpack.c.bf16 %v980_v17, %v965_v14  ;;  %v850_v57 = vmov 0.0|0.0   ;;  %v749_v58 = vpack.c.bf16 %v955_v12, %v940_v9  ;;  %s395_s16 = sshra.s32 %s607_s3, 3  ;;  %s572_s21 = scalar_lea.vmem %s1291_s5, %s607_s3 }
 0x11c   : > { %714 = vmatprep.subr.bf16.mxu0 %v713_v50  ;;  %745 = vmatprep.subr.bf16.mxu1 %v850_v57  ;;  %v851_v59 = vmov 0.0   ;;  %v723_v61 = vpack.c.bf16 %v975_v16, %v960_v13  ;;  %v725_v62 = vpack.c.bf16 %v1010_v23, %v995_v20  ;;  %vm852_vm1 = vmmov 0   ;;  %s612_s17 = smul.u32 24, %s395_s16  ;;  %p389_p8 = scmp.ge.s32.totalorder %s392_s0, 8  }
 0x11d   : > { %716 = vmatpush1.bf16.msra.mxu0 %v715_v51  ;;  %747 = vmatpush3.bf16.msra.mxu1 %v746_v0  ;;  %v752_v45 = vpack.c.bf16 %v985_v18, %v970_v15  ;;  %v727_v48 = vpack.c.bf16 %v1005_v22, %v990_v19  ;;  %v729_v46 = vpack.c.bf16 %v1040_v29, %v1025_v26 }
 0x11e   : > { %718 = vmatprep.subr.bf16.mxu0 %v717_v54  ;;  %467 = vmatprep.mubr.f32.mxu0 %v851_v59  ;;  %v755_v49 = vpack.c.bf16 %v1015_v24, %v1000_v21  ;;  %v731_v63 = vpack.c.bf16 %v1035_v28, %v1020_v25  ;;  %v733_v53 = vpack.c.bf16 %v1070_v35, %v1055_v32  ;;  %s399_s18 = scalar_lea.vmem [#allocation2], %s612_s17 }
 0x11f   : > { %748 = vmatprep.subr.bf16.mxu1 %v850_v57  ;;  %694 = vmatprep.mubr.msk.f32.mxu1 %vm852_vm1, %v851_v59  ;;  %v758_v60 = vpack.c.bf16 %v1045_v30, %v1030_v27  ;;  %v735_v50 = vpack.c.bf16 %v1065_v34, %v1050_v31  ;;  %v737_v51 = vpack.c.bf16 %v1100_v41, %v1085_v38 }
 0x120   : > { %v761_v54 = vpack.c.bf16 %v1075_v36, %v1060_v33  ;;  %v741_v0 = vpack.c.bf16 %v1130_v47, %v1115_v44 }
 0x121   : > { %720 = vmatpush1.bf16.msra.mxu0 %v719_v55  ;;  %750 = vmatpush3.bf16.msra.mxu1 %v749_v58  ;;  %v739_v55 = vpack.c.bf16 %v1095_v40, %v1080_v37  ;;  %v1299_v58 = vld [vmem:[#allocation7_spill] sm:$0xff] }
 0x122   : > { %722 = vmatprep.subr.bf16.mxu0 %v721_v56  ;;  %751 = vmatprep.subr.bf16.mxu1 %v850_v57  ;;  %v764_v56 = vpack.c.bf16 %v1105_v42, %v1090_v39  ;;  %v743_v59 = vpack.c.bf16 %v1299_v58, %v1110_v43 }
 0x125   : > { %724 = vmatpush1.bf16.msra.mxu0 %v723_v61  ;;  %753 = vmatpush3.bf16.msra.mxu1 %v752_v45  ;;  %v1300_v61 = vld [vmem:[#allocation6_spill] sm:$0xff] }
 0x126   : > { %726 = vmatprep.subr.bf16.mxu0 %v725_v62  ;;  %754 = vmatprep.subr.bf16.mxu1 %v850_v57  ;;  %v1301_v62 = vld [vmem:[#allocation8_spill] sm:$0xff] }
 0x127   : > { %v767_v45 = vpack.c.bf16 %v1301_v62, %v1300_v61 }
 0x129   : > { %728 = vmatpush1.bf16.msra.mxu0 %v727_v48  ;;  %756 = vmatpush3.bf16.msra.mxu1 %v755_v49  ;;  %v400_v48 = vld [vmem:[%s399_s18] sm:$0xff] }
 0x12a   : > { %730 = vmatprep.subr.bf16.mxu0 %v729_v46  ;;  %757 = vmatprep.subr.bf16.mxu1 %v850_v57 }
 0x12d   : > { %732 = vmatpush1.bf16.msra.mxu0 %v731_v63  ;;  %759 = vmatpush3.bf16.msra.mxu1 %v758_v60  ;;  %v401_v63 = vld [vmem:[%s399_s18 + $0x8] sm:$0xff] }
 0x12e   : > { %734 = vmatprep.subr.bf16.mxu0 %v733_v53  ;;  %760 = vmatprep.subr.bf16.mxu1 %v850_v57 }
 0x131   : > { %736 = vmatpush1.bf16.msra.mxu0 %v735_v50  ;;  %762 = vmatpush3.bf16.msra.mxu1 %v761_v54 }
 0x132   : > { %738 = vmatprep.subr.bf16.mxu0 %v737_v51  ;;  %763 = vmatprep.subr.bf16.mxu1 %v850_v57 }
 0x135   : > { %740 = vmatpush1.bf16.msra.mxu0 %v739_v55  ;;  %765 = vmatpush3.bf16.msra.mxu1 %v764_v56 }
 0x136   : > { %742 = vmatprep.subr.bf16.mxu0 %v741_v0  ;;  %766 = vmatprep.subr.bf16.mxu1 %v850_v57 }
 0x139   : > { %744 = vmatpush1.bf16.msra.mxu0 %v743_v59  ;;  %768 = vmatpush3.bf16.msra.mxu1 %v767_v45  ;;  %v1302_v59 = vld [vmem:[#allocation9_spill] sm:$0xff]  ;;  %v402_v45 = vld [vmem:[%s399_s18 + $0x10] sm:$0xff] }
 0x13c   : > { %468 = vmatmul.mubr.f32.vlgmr.msra.gmra.mrb[0].mxu0 %v840_v52  ;;  %695 = vmatmul.mubr.f32.vlgmr.msra.gmra.mrb[0].mxu1 %v840_v52 }
 0x20f   : > { %v469_v46 = vpop.f32.mrb[0].mxu0  ;;  %v540_v60 = vpop.f32.mrb[0].mxu1 }
 0x210   : > { %v544_v49 = vadd.f32 %v469_v46, %v400_v48  ;;  %v471_v53 = vpop.f32.mrb[1].mxu0  ;;  %v696_v51 = vpop.f32.mrb[1].mxu1  ;;  %v564_v61 = vadd.f32 %v1302_v59, %v540_v60 }
 0x211   : > { %v551_v57 = vadd.f32 %v471_v53, %v401_v63 }
 0x212   : > { %v609_v50 = vmul.f32 -1.442695, %v544_v49 }
 0x213   : > { %v610_v54 = vmul.f32 -1.442695, %v551_v57 }
 0x214   : > { %796 = vpow2.f32 %v609_v50 }
 0x215   : > { %798 = vpow2.f32 %v610_v54 }
 0x21e   : > { %v797_v55 = vpop.eup %796 }
 0x21f   : > { %v548_v0 = vadd.f32 1.0, %v797_v55  ;;  %v799_v56 = vpop.eup %798 }
 0x220   : > { %v555_v58 = vadd.f32 1.0, %v799_v56 }
 0x221   : > { %800 = vrcp.f32 %v548_v0 }
 0x222   : > { %802 = vrcp.f32 %v555_v58 }
 0x22b   : > { %v801_v62 = vpop.eup %800 }
 0x22c   : > { %v565_v48 = vmul.f32 %v801_v62, %v564_v61  ;;  %v803_v49 = vpop.eup %802 }
 0x22d   : > { %v568_v51 = vsub.f32 1.0, %v803_v49  ;;  %v570_v53 = vmul.f32 %v840_v52, %v803_v49 }
 0x22e   : > { %v566_v46 = vadd.f32 %v565_v48, %v402_v45 }
 0x230   : > { %804 = vtanh.f32 %v566_v46 }
 0x239   :  { %391 = sbr.rel (!%p389_p8) target bundleno = 282 (0x11a), region = 53 }
 0x23a   : > { %v805_v63 = vpop.eup %804 }
 0x23b   : > { %v569_v50 = vmul.f32 %v805_v63, %v568_v51 }
 0x23d   : > { %v571_v52 = vadd.f32 %v570_v53, %v569_v50  }
 0x23f   : > { %573 = vst [vmem:[%s572_s21] sm:$0xff] %v571_v52 }
 0x240   :  { %578 = vsyncpa [#allocation4], 1 }

</bundles_post_ra>
